<compile_context>
chip_gen: v7x
topology: tpu7x:2x2x1
jax: 0.10.0
libtpu: 0.0.40
codegen_flags: <defaults>
</compile_context>

<pallas_src>
import functools

import jax
import jax.numpy as jnp
from jax import lax
from jax.experimental import pallas as pl
from jax.experimental.pallas import tpu as pltpu


# ---------------------------------------------------------------------------
# Kernels
# ---------------------------------------------------------------------------
def _split_kernel_packed(x_ref, hsum_ref, o_ref, *, scale, w):
    """Lane-dense path for w == 64 (mod 128) (demo: w = 64, 2w = 128).

    x_ref   : (Bb, M, 2w)     row m = [y+_m (w) | y-_m (w)]
    hsum_ref: (1, M//2, 2w)   row r = [sum(H[2r]) x w | sum(H[2r+1]) x w]
    o_ref   : (Bb, M//2, 2w)  row r = [out_{2r} (w) | out_{2r+1} (w)]
    """
    mh = o_ref.shape[1]
    # Sublane-strided reads split even/odd measurement rows; the HBM DMA of
    # the block stays dense, the striding is only VMEM->vreg (slack here).
    ev = x_ref[:, pl.ds(0, mh, stride=2), :]            # rows 0, 2, 4, ...
    od = x_ref[:, pl.ds(1, mh, stride=2), :]            # rows 1, 3, 5, ...
    # shift == half the lane width, so rotation direction is irrelevant.
    d_ev = ev - pltpu.roll(ev, shift=w, axis=2)         # valid in lanes [0, w)
    d_od = pltpu.roll(od, shift=w, axis=2) - od         # valid in lanes [w, 2w)
    lane = lax.broadcasted_iota(jnp.int32, d_ev.shape, 2)
    diff = jnp.where(lane < w, d_ev, d_od)
    o_ref[...] = (scale * diff - hsum_ref[...]).astype(o_ref.dtype)


def _split_kernel_wide(x_ref, hsum_ref, o_ref, *, scale, w):
    """Generic path. For w % 128 == 0 all slices/stores are dense & unmasked.

    x_ref   : (Bb, M, 2w)   row m = [y+_m | y-_m]
    hsum_ref: (1, M, 1)
    o_ref   : (Bb, M, w)
    """
    diff = x_ref[:, :, :w] - x_ref[:, :, w:]
    o_ref[...] = (scale * diff - hsum_ref[...]).astype(o_ref.dtype)


# ---------------------------------------------------------------------------
# VMEM accounting / tiling
# ---------------------------------------------------------------------------
def _round_up(v, m):
    return -(-int(v) // int(m)) * int(m)


def _padded_tile_bytes(block_shape, dtype):
    """(8,128)-style padded VMEM bytes of one buffer of `block_shape`."""
    item = jnp.dtype(dtype).itemsize
    sublane = 32 // item                       # 8 for f32, 16 for bf16, 32 for i8
    if len(block_shape) == 1:
        lead, s, l = (), 1, block_shape[0]
    else:
        *lead, s, l = block_shape
    n = 1
    for d in lead:
        n *= int(d)
    return n * _round_up(s, sublane) * _round_up(l, 128) * item


def _vmem_capacity_bytes():
    try:
        info = pltpu.get_tpu_info()
        for name in ("vmem_capacity_bytes", "vmem_bytes", "vmem_size_bytes"):
            v = getattr(info, name, None)
            if v:
                return int(v)
    except Exception:
        pass
    return 64 << 20                            # assume the smallest (v7x-class)


def _choose_batch_block(B, in_elem_shape, out_elem_shape, hsum_shape, dtype):
    cap = _vmem_capacity_bytes()
    small_vmem = cap <= (64 << 20)             # v7x-class: 64 MiB / TC, 2 TCs
    budget = (24 << 20) if small_vmem else (80 << 20)

    # Padded, double-buffered footprint per batch element (input + output),
    # plus the resident hsum tile (counted double-buffered, conservative).
    per_b = 2 * (_padded_tile_bytes((1,) + tuple(in_elem_shape), dtype)
                 + _padded_tile_bytes((1,) + tuple(out_elem_shape), dtype))
    fixed = 2 * _padded_tile_bytes(tuple(hsum_shape), jnp.float32)

    bb = max(1, min(B, (budget - fixed) // per_b))
    steps = pl.cdiv(B, bb)
    # On two-TensorCore parts prefer an even, balanced step count when the
    # problem does not fit in one step (minor: the kernel is HBM-bound).
    if small_vmem and steps > 1 and steps % 2 == 1:
        bb = pl.cdiv(B, steps + 1)
        steps = pl.cdiv(B, bb)

    est = bb * per_b + fixed
    vmem_limit = int(min(cap - (4 << 20), max(est + (4 << 20), 32 << 20)))
    return int(bb), int(steps), vmem_limit


# ---------------------------------------------------------------------------
# Wrapper
# ---------------------------------------------------------------------------
def split_row_poisson(x, H, alpha, M, h):
    """x: (B, 2M, W) with B = batch*channels; H = H_pos - H_neg of shape (M, N).

    Returns (B, M, W) with out = 2*(y+ - y-)/alpha - H @ ones(N, W).
    """
    B, twoM, W = x.shape
    N = H.shape[1]
    assert twoM == 2 * M and N == h and W == h, "module assumes w == h == meas_op.N"

    # Free row-major view: row m of xr = [y+_m (W) | y-_m (W)]  (lane-dense).
    xr = x.reshape(B, M, 2 * W)
    # meas_op.forward_H(ones) == H @ ones(N, W) == sum(H, axis=1) broadcast on W.
    hsum = jnp.sum(H.astype(jnp.float32), axis=1)              # (M,)
    scale = 2.0 / float(alpha)

    packed = (2 * W) % 128 == 0 and W % 128 != 0 and M % 2 == 0
    if packed:
        Mh = M // 2
        out_elem = (Mh, 2 * W)
        hsum_b = jnp.repeat(hsum.reshape(Mh, 2), W, axis=1).reshape(1, Mh, 2 * W)
        hsum_spec = pl.BlockSpec((1, Mh, 2 * W), lambda b: (0, 0, 0))
        kernel = functools.partial(_split_kernel_packed, scale=scale, w=W)
        out_shape = jax.ShapeDtypeStruct((B, Mh, 2 * W), x.dtype)
    else:
        # TODO(synk): widths that are neither multiples of 128 nor == 64 mod 128
        # fall back to a masked-store layout (correct, just not lane-dense).
        out_elem = (M, W)
        hsum_b = hsum.reshape(1, M, 1)
        hsum_spec = pl.BlockSpec((1, M, 1), lambda b: (0, 0, 0))
        kernel = functools.partial(_split_kernel_wide, scale=scale, w=W)
        out_shape = jax.ShapeDtypeStruct((B, M, W), x.dtype)

    bb, steps, vmem_limit = _choose_batch_block(
        B, (M, 2 * W), out_elem, hsum_b.shape, x.dtype)

    out = pl.pallas_call(
        kernel,
        out_shape=out_shape,
        grid_spec=pltpu.PrefetchScalarGridSpec(
            num_scalar_prefetch=0,
            grid=(steps,),
            in_specs=[
                # bb batch elements per grid step; full (M, 2W) per element.
                pl.BlockSpec((bb, M, 2 * W), lambda b: (b, 0, 0)),
                # Tiny batch-invariant correction tile; same block every step.
                hsum_spec,
            ],
            out_specs=pl.BlockSpec((bb,) + out_elem, lambda b: (b, 0, 0)),
        ),
        compiler_params=pltpu.CompilerParams(
            dimension_semantics=("parallel",),
            vmem_limit_bytes=vmem_limit,
        ),
    )(xr, hsum_b)

    return out.reshape(B, M, W) if packed else out


if __name__ == "__main__":
    # Shapes consistent with the module docstring: b=2, c=4 -> B = 8, M = 24,
    # h = w = N = 64, so x is (8, 48, 64).
    alpha = 2.0
    M = 24
    h = 64          # image height == width == meas_op.N
    B = 2 * 4       # b * c

    key = jax.random.PRNGKey(0)
    kx, kp, kn = jax.random.split(key, 3)
    x = jax.random.uniform(kx, (B, 2 * M, h), dtype=jnp.float32)
    # Deterministic synthetic LinearRowSplit weights (shapes (M, N)).
    H_pos = jax.random.uniform(kp, (M, h), dtype=jnp.float32)
    H_neg = jax.random.uniform(kn, (M, h), dtype=jnp.float32)
    H = H_pos - H_neg  # meas_op.H used by forward_H

    out = split_row_poisson(x, H, alpha, M, h)
    out = jax.block_until_ready(out)

    # Pure-JAX reference for correctness.
    diff = x[:, 0::2, :] - x[:, 1::2, :]
    ref = 2.0 * diff / alpha - jnp.sum(H, axis=1)[None, :, None]
    assert out.shape == (B, M, h)
    assert jnp.allclose(out, ref, atol=1e-4, rtol=1e-4), "mismatch vs reference"

    print("KERNEL_OK")
</pallas_src>

<mosaic_0001>
module attributes {stable_mosaic.version = 11 : i64} {
  func.func @_split_kernel_packed(%arg0: i32, %arg1: memref<8x24x128xf32, #tpu.memory_space<vmem>>, %arg2: memref<1x12x128xf32, #tpu.memory_space<vmem>>, %arg3: memref<8x12x128xf32, #tpu.memory_space<vmem>>) attributes {dimension_semantics = [#tpu.dimension_semantics<parallel>], iteration_bounds = array<i64: 1>, scalar_prefetch = 0 : i64, scratch_operands = 0 : i64, tpu.core_type = #tpu.core_type<tc>, window_params = [{transform_indices = @transform_0, window_bounds = array<i64: 8, 24, 128>}, {pipeline_mode = #tpu.pipeline_mode<synchronous>, transform_indices = @transform_1, window_bounds = array<i64: 1, 12, 128>}, {transform_indices = @transform_2, window_bounds = array<i64: 8, 12, 128>}]} {
    %c0 = arith.constant 0 : index
    %c0_0 = arith.constant 0 : index
    %c0_1 = arith.constant 0 : index
    %0 = tpu.strided_load %arg1[%c0, %c0_0, %c0_1] {strides = array<i32: 1, 2, 1>} : memref<8x24x128xf32, #tpu.memory_space<vmem>>, vector<8x12x128xf32>
    %c0_2 = arith.constant 0 : index
    %c1 = arith.constant 1 : index
    %c0_3 = arith.constant 0 : index
    %1 = tpu.strided_load %arg1[%c0_2, %c1, %c0_3] {strides = array<i32: 1, 2, 1>} : memref<8x24x128xf32, #tpu.memory_space<vmem>>, vector<8x12x128xf32>
    %c64_i32 = arith.constant 64 : i32
    %2 = tpu.dynamic_rotate %0 by %c64_i32 dim 2 : vector<8x12x128xf32>, i32 -> vector<8x12x128xf32>
    %3 = arith.subf %0, %2 : vector<8x12x128xf32>
    %c64_i32_4 = arith.constant 64 : i32
    %4 = tpu.dynamic_rotate %1 by %c64_i32_4 dim 2 : vector<8x12x128xf32>, i32 -> vector<8x12x128xf32>
    %5 = arith.subf %4, %1 : vector<8x12x128xf32>
    %6 = tpu.iota {dimensions = array<i32: 2>} : vector<8x12x128xi32>
    %c64_i32_5 = arith.constant 64 : i32
    %7 = vector.broadcast %c64_i32_5 : i32 to vector<8x12x128xi32>
    %8 = arith.cmpi slt, %6, %7 : vector<8x12x128xi32>
    %9 = arith.select %8, %3, %5 : vector<8x12x128xi1>, vector<8x12x128xf32>
    %cst = arith.constant 1.000000e+00 : f32
    %10 = vector.broadcast %cst : f32 to vector<8x12x128xf32>
    %11 = arith.mulf %10, %9 : vector<8x12x128xf32>
    %c0_6 = arith.constant 0 : index
    %c0_7 = arith.constant 0 : index
    %c0_8 = arith.constant 0 : index
    %12 = vector.load %arg2[%c0_6, %c0_7, %c0_8] : memref<1x12x128xf32, #tpu.memory_space<vmem>>, vector<1x12x128xf32>
    %13 = vector.broadcast %12 : vector<1x12x128xf32> to vector<8x12x128xf32>
    %14 = arith.subf %11, %13 : vector<8x12x128xf32>
    %c0_9 = arith.constant 0 : index
    %c0_10 = arith.constant 0 : index
    %c0_11 = arith.constant 0 : index
    %15 = vector.load %arg3[%c0_9, %c0_10, %c0_11] : memref<8x12x128xf32, #tpu.memory_space<vmem>>, vector<8x12x128xf32>
    tpu.vector_store %arg3[%c0_9, %c0_10, %c0_11], %14 {strides = array<i32>} : memref<8x12x128xf32, #tpu.memory_space<vmem>>, vector<8x12x128xf32>,
    return
  }
  func.func @transform_0(%arg0: i32) -> (i32, i32, i32) {
    %c0_i32 = arith.constant 0 : i32
    %c0_i32_0 = arith.constant 0 : i32
    %c0_i32_1 = arith.constant 0 : i32
    return %arg0, %c0_i32, %c0_i32_0 : i32, i32, i32
  }
  func.func @transform_1(%arg0: i32) -> (i32, i32, i32) {
    %c0_i32 = arith.constant 0 : i32
    %c0_i32_0 = arith.constant 0 : i32
    %c0_i32_1 = arith.constant 0 : i32
    %c0_i32_2 = arith.constant 0 : i32
    return %c0_i32, %c0_i32_0, %c0_i32_1 : i32, i32, i32
  }
  func.func @transform_2(%arg0: i32) -> (i32, i32, i32) {
    %c0_i32 = arith.constant 0 : i32
    %c0_i32_0 = arith.constant 0 : i32
    %c0_i32_1 = arith.constant 0 : i32
    return %arg0, %c0_i32, %c0_i32_0 : i32, i32, i32
  }
}

</mosaic_0001>

<bundles_post_ra>
// kernel: tpu_custom_call.1
= control target key start
LH: loop header
LB: loop body
LE: loop exit
PB: predicated region body
PF: predicated region fallthrough
CT: control target
= control target key end

     0   :  { %7 = vsyncpa [#allocation3], 0  ;;  %s270_s9 = smov [#allocation2]   ;;  %s586_s0 = inlined_call_operand.hbm [shape: f32[8,24,128], index: 0, kind: input, shape index: {}]   ;;  %s587_s1 = inlined_call_operand.vmem [shape: f32[1,12,128], index: 1, kind: input, shape index: {}]   ;;  %s588_s2 = inlined_call_operand.vmem [shape: f32[8,12,128], index: 2, kind: output, shape index: {}]  }
   0x1   :  { %s13_s10 = sshll.u32 %s270_s9, 4  ;;  %s246_s13 = scalar_lea.hbm %s586_s0, 3072  ;;  %s14_s10 = int_to_ptr.vmem [resolvable:$true] %s13_s10 }
   0x2   :  { %p247_p0 = scmp.ne.s32.totalorder %s586_s0, %s246_s13  ;;  %p250_p1 = scmp.lt.u32.totalorder %s246_s13, %s586_s0 }
   0x4   :  { %p252_p2 = pnand %p250_p1, %p247_p0 }
   0x6   :  { %255 = shalt.err (!%p252_p2)
}
   0x7   :  { %s256_s18 = scalar_lea.vmem %s14_s10, 3072  ;;  %p261_p4 = scmp.lt.s32.totalorder %s14_s10, %s14_s10 }
   0x8   :  { %p257_p3 = scmp.ne.s32.totalorder %s14_s10, %s256_s18  ;;  %p262_p5 = scmp.lt.s32.totalorder %s256_s18, %s256_s18 }
   0xa   :  { %p263_p6 = por %p262_p5, %p261_p4 }
   0xc   :  { %p264_p7 = pnand %p263_p6, %p257_p3 }
   0xe   :  { %267 = shalt.err (!%p264_p7)
}
   0xf   :  { %s271_s19 = smov 128   ;;  %s272_s20 = smov 8  }
  0x10   :  { %19 = dma.hbm_to_vmem [thread:$0]  %s586_s0, 3072, %s14_s10, [#allocation3], %s271_s19, %s271_s19, %s272_s20  }
  0x11   :  { %268 = dma.done.wait [#allocation3], 3072  }
  0x12   :  { %269 = vsyncadd [#allocation3], 4294964224  ;;  %v301_v0 = vld [vmem:[#allocation2 + $0x18] ss:$2 sm:$0xff]  ;;  %s273_s23 = smov 64   ;;  %v184_v46 = vlaneseq }
  0x13   :  { %v303_v1 = vld [vmem:[#allocation2] ss:$2 sm:$0xff]  ;;  %92 = vrot.lane.b32.xlu1 %v301_v0, %s273_s23  ;;  %v311_v3 = vld [vmem:[#allocation2 + $0x10] ss:$2 sm:$0xf] }
  0x14   :  { %88 = vrot.lane.b32.xlu0 %v303_v1, %s273_s23  ;;  %v309_v2 = vld [vmem:[#allocation2 + $0x28] ss:$2 sm:$0xf]  ;;  %v317_v4 = vld [vmem:[#allocation2 + $0x40] ss:$2 sm:$0xf] }
  0x15   :  { %v319_v5 = vld [vmem:[#allocation2 + $0x30] ss:$2 sm:$0xff]  ;;  %v335_v9 = vld [vmem:[#allocation2 + $0x60] ss:$2 sm:$0xff]  ;;  %v57_v17 = vld [vmem:[#allocation2 + $0x1] ss:$2 sm:$0xff] }
  0x16   :  { %v325_v6 = vld [vmem:[#allocation2 + $0x58] ss:$2 sm:$0xf]  ;;  %v327_v7 = vld [vmem:[#allocation2 + $0x48] ss:$2 sm:$0xff]  ;;  %v439_v49 = vand.u32 127, %v184_v46 }
  0x17   :  { %94 = vrot.lane.b32.xlu1 %v309_v2, %s273_s23  ;;  %v333_v8 = vld [vmem:[#allocation2 + $0x70] ss:$2 sm:$0xf]  ;;  %v341_v10 = vld [vmem:[#allocation2 + $0x88] ss:$2 sm:$0xf] }
  0x18   :  { %90 = vrot.lane.b32.xlu0 %v311_v3, %s273_s23  ;;  %v343_v11 = vld [vmem:[#allocation2 + $0x78] ss:$2 sm:$0xff]  ;;  %v359_v15 = vld [vmem:[#allocation2 + $0xa8] ss:$2 sm:$0xff]  ;;  %v369_v19 = vld [vmem:[#allocation2 + $0x19] ss:$2 sm:$0xff] }
  0x19   :  { %v349_v12 = vld [vmem:[#allocation2 + $0xa0] ss:$2 sm:$0xf]  ;;  %v351_v13 = vld [vmem:[#allocation2 + $0x90] ss:$2 sm:$0xff]  ;;  %vm186_vm0 = vcmp.lt.s32.totalorder %v439_v49, 64 }
  0x1a   :  { %v357_v14 = vld [vmem:[#allocation2 + $0xb8] ss:$2 sm:$0xf]  ;;  %v59_v16 = vld [vmem:[#allocation2 + $0x11] ss:$2 sm:$0xf] }
  0x1b   :  { %98 = vrot.lane.b32.xlu1 %v317_v4, %s273_s23  ;;  %v367_v18 = vld [vmem:[#allocation2 + $0x29] ss:$2 sm:$0xf]  ;;  %v375_v20 = vld [vmem:[#allocation2 + $0x41] ss:$2 sm:$0xf] }
  0x1c   :  { %96 = vrot.lane.b32.xlu0 %v319_v5, %s273_s23  ;;  %v377_v21 = vld [vmem:[#allocation2 + $0x31] ss:$2 sm:$0xff]  ;;  %v393_v25 = vld [vmem:[#allocation2 + $0x61] ss:$2 sm:$0xff] }
  0x1d   :  { %v383_v22 = vld [vmem:[#allocation2 + $0x59] ss:$2 sm:$0xf]  ;;  %v385_v23 = vld [vmem:[#allocation2 + $0x49] ss:$2 sm:$0xff]  ;;  %v452_v56 = vld [vmem:[%s587_s1] sm:$0xff] }
  0x1e   :  { %v391_v24 = vld [vmem:[#allocation2 + $0x71] ss:$2 sm:$0xf]  ;;  %v399_v26 = vld [vmem:[#allocation2 + $0x89] ss:$2 sm:$0xf] }
  0x1f   :  { %102 = vrot.lane.b32.xlu1 %v325_v6, %s273_s23  ;;  %v401_v27 = vld [vmem:[#allocation2 + $0x79] ss:$2 sm:$0xff]  ;;  %v417_v31 = vld [vmem:[#allocation2 + $0xa9] ss:$2 sm:$0xff] }
  0x20   :  { %100 = vrot.lane.b32.xlu0 %v327_v7, %s273_s23  ;;  %v407_v28 = vld [vmem:[#allocation2 + $0xa1] ss:$2 sm:$0xf]  ;;  %v409_v29 = vld [vmem:[#allocation2 + $0x91] ss:$2 sm:$0xff] }
  0x21   :  { %v415_v30 = vld [vmem:[#allocation2 + $0xb9] ss:$2 sm:$0xf]  ;;  %v447_v54 = vld [vmem:[%s587_s1 + $0x8] sm:$0xf] }
  0x23   :  { %106 = vrot.lane.b32.xlu1 %v333_v8, %s273_s23 }
  0x24   :  { %104 = vrot.lane.b32.xlu0 %v335_v9, %s273_s23 }
  0x27   :  { %110 = vrot.lane.b32.xlu1 %v341_v10, %s273_s23 }
  0x28   :  { %108 = vrot.lane.b32.xlu0 %v343_v11, %s273_s23 }
  0x2b   :  { %114 = vrot.lane.b32.xlu1 %v349_v12, %s273_s23 }
  0x2c   :  { %112 = vrot.lane.b32.xlu0 %v351_v13, %s273_s23 }
  0x2f   :  { %118 = vrot.lane.b32.xlu1 %v357_v14, %s273_s23 }
  0x30   :  { %116 = vrot.lane.b32.xlu0 %v359_v15, %s273_s23 }
  0x33   :  { %138 = vrot.lane.b32.xlu1 %v59_v16, %s273_s23 }
  0x34   :  { %136 = vrot.lane.b32.xlu0 %v57_v17, %s273_s23 }
  0x37   :  { %142 = vrot.lane.b32.xlu1 %v367_v18, %s273_s23 }
  0x38   :  { %140 = vrot.lane.b32.xlu0 %v369_v19, %s273_s23 }
  0x3b   :  { %146 = vrot.lane.b32.xlu1 %v375_v20, %s273_s23 }
  0x3c   :  { %144 = vrot.lane.b32.xlu0 %v377_v21, %s273_s23 }
  0x3f   :  { %150 = vrot.lane.b32.xlu1 %v383_v22, %s273_s23 }
  0x40   :  { %148 = vrot.lane.b32.xlu0 %v385_v23, %s273_s23 }
  0x43   :  { %154 = vrot.lane.b32.xlu1 %v391_v24, %s273_s23 }
  0x44   :  { %152 = vrot.lane.b32.xlu0 %v393_v25, %s273_s23 }
  0x47   :  { %158 = vrot.lane.b32.xlu1 %v399_v26, %s273_s23 }
  0x48   :  { %156 = vrot.lane.b32.xlu0 %v401_v27, %s273_s23 }
  0x4b   :  { %162 = vrot.lane.b32.xlu1 %v407_v28, %s273_s23 }
  0x4c   :  { %160 = vrot.lane.b32.xlu0 %v409_v29, %s273_s23 }
  0x4f   :  { %166 = vrot.lane.b32.xlu1 %v415_v30, %s273_s23 }
  0x50   :  { %164 = vrot.lane.b32.xlu0 %v417_v31, %s273_s23 }
  0x85   :  { %v93_v32 = vpop.permute.xlu1 %92 }
  0x86   :  { %v89_v33 = vpop.permute.xlu0 %88 }
  0x87   :  { %v120_v52 = vsub.f32 %v303_v1, %v89_v33  ;;  %v122_v1 = vsub.f32 %v301_v0, %v93_v32 }
  0x89   :  { %v95_v34 = vpop.permute.xlu1 %94 }
  0x8a   :  { %v91_v35 = vpop.permute.xlu0 %90 }
  0x8b   :  { %v121_v53 = vsub.f32 %v311_v3, %v91_v35  ;;  %v123_v3 = vsub.f32 %v309_v2, %v95_v34 }
  0x8d   :  { %v99_v36 = vpop.permute.xlu1 %98 }
  0x8e   :  { %v97_v37 = vpop.permute.xlu0 %96  ;;  %v125_v34 = vsub.f32 %v317_v4, %v99_v36 }
  0x8f   :  { %v124_v35 = vsub.f32 %v319_v5, %v97_v37 }
  0x91   :  { %v103_v38 = vpop.permute.xlu1 %102 }
  0x92   :  { %v101_v39 = vpop.permute.xlu0 %100  ;;  %v127_v37 = vsub.f32 %v325_v6, %v103_v38 }
  0x95   :  { %v423_v40 = vpop.permute.xlu1 %106 }
  0x96   :  { %v425_v41 = vpop.permute.xlu0 %104 }
  0x99   :  { %v427_v42 = vpop.permute.xlu1 %110 }
  0x9a   :  { %v429_v43 = vpop.permute.xlu0 %108 }
  0x9d   :  { %v431_v44 = vpop.permute.xlu1 %114 }
  0x9e   :  { %v433_v45 = vpop.permute.xlu0 %112 }
  0xa1   :  { %v435_v47 = vpop.permute.xlu1 %118 }
  0xa2   :  { %v437_v48 = vpop.permute.xlu0 %116 }
  0xa5   :  { %v139_v50 = vpop.permute.xlu1 %138 }
  0xa6   :  { %v137_v51 = vpop.permute.xlu0 %136  ;;  %v169_v55 = vsub.f32 %v139_v50, %v59_v16 }
  0xa7   :  { %v168_v57 = vsub.f32 %v137_v51, %v57_v17 }
  0xa8   :  { %v188_v58 = vsel %vm186_vm0, %v121_v53, %v169_v55 }
  0xa9   :  { %v187_v59 = vsel %vm186_vm0, %v120_v52, %v168_v57  ;;  %v206_v60 = vsub.f32 %v188_v58, %v447_v54  ;;  %v143_v62 = vpop.permute.xlu1 %142  ;;  %v126_v52 = vsub.f32 %v327_v7, %v101_v39  ;;  %v129_v39 = vsub.f32 %v333_v8, %v423_v40 }
  0xaa   :  { %v205_v61 = vsub.f32 %v187_v59, %v452_v56  ;;  %v141_v63 = vpop.permute.xlu0 %140  ;;  %v171_v16 = vsub.f32 %v143_v62, %v367_v18  ;;  %v128_v58 = vsub.f32 %v335_v9, %v425_v41  ;;  %v131_v41 = vsub.f32 %v341_v10, %v427_v42 }
  0xab   :  { %v170_v17 = vsub.f32 %v141_v63, %v369_v19  ;;  %222 = vst [vmem:[%s588_s2 + $0x8] sm:$0xf] %v206_v60  ;;  %v130_v62 = vsub.f32 %v343_v11, %v429_v43  ;;  %v133_v43 = vsub.f32 %v349_v12, %v431_v44 }
  0xac   :  { %221 = vst [vmem:[%s588_s2] sm:$0xff] %v205_v61  ;;  %v190_v33 = vsel %vm186_vm0, %v123_v3, %v171_v16  ;;  %v132_v16 = vsub.f32 %v351_v13, %v433_v45  ;;  %v135_v45 = vsub.f32 %v357_v14, %v435_v47 }
  0xad   :  { %v189_v0 = vsel %vm186_vm0, %v122_v1, %v170_v17  ;;  %v208_v2 = vsub.f32 %v190_v33, %v447_v54  ;;  %v147_v32 = vpop.permute.xlu1 %146 }
  0xae   :  { %v207_v18 = vsub.f32 %v189_v0, %v452_v56  ;;  %v145_v19 = vpop.permute.xlu0 %144  ;;  %v173_v46 = vsub.f32 %v147_v32, %v375_v20 }
  0xaf   :  { %v172_v50 = vsub.f32 %v145_v19, %v377_v21  ;;  %224 = vst [vmem:[%s588_s2 + $0x18] sm:$0xf] %v208_v2  ;;  %v134_v2 = vsub.f32 %v359_v15, %v437_v48 }
  0xb0   :  { %223 = vst [vmem:[%s588_s2 + $0x10] sm:$0xff] %v207_v18  ;;  %v192_v51 = vsel %vm186_vm0, %v125_v34, %v173_v46 }
  0xb1   :  { %v191_v4 = vsel %vm186_vm0, %v124_v35, %v172_v50  ;;  %v210_v5 = vsub.f32 %v192_v51, %v447_v54  ;;  %v151_v36 = vpop.permute.xlu1 %150 }
  0xb2   :  { %v209_v20 = vsub.f32 %v191_v4, %v452_v56  ;;  %v149_v21 = vpop.permute.xlu0 %148  ;;  %v175_v53 = vsub.f32 %v151_v36, %v383_v22 }
  0xb3   :  { %v174_v55 = vsub.f32 %v149_v21, %v385_v23  ;;  %226 = vst [vmem:[%s588_s2 + $0x28] sm:$0xf] %v210_v5 }
  0xb4   :  { %225 = vst [vmem:[%s588_s2 + $0x20] sm:$0xff] %v209_v20  ;;  %v194_v57 = vsel %vm186_vm0, %v127_v37, %v175_v53 }
  0xb5   :  { %v193_v6 = vsel %vm186_vm0, %v126_v52, %v174_v55  ;;  %v212_v7 = vsub.f32 %v194_v57, %v447_v54  ;;  %v155_v38 = vpop.permute.xlu1 %154 }
  0xb6   :  { %v211_v22 = vsub.f32 %v193_v6, %v452_v56  ;;  %v153_v23 = vpop.permute.xlu0 %152  ;;  %v177_v59 = vsub.f32 %v155_v38, %v391_v24 }
  0xb7   :  { %v176_v60 = vsub.f32 %v153_v23, %v393_v25  ;;  %228 = vst [vmem:[%s588_s2 + $0x38] sm:$0xf] %v212_v7 }
  0xb8   :  { %227 = vst [vmem:[%s588_s2 + $0x30] sm:$0xff] %v211_v22  ;;  %v196_v61 = vsel %vm186_vm0, %v129_v39, %v177_v59 }
  0xb9   :  { %v195_v8 = vsel %vm186_vm0, %v128_v58, %v176_v60  ;;  %v214_v9 = vsub.f32 %v196_v61, %v447_v54  ;;  %v159_v40 = vpop.permute.xlu1 %158 }
  0xba   :  { %v213_v24 = vsub.f32 %v195_v8, %v452_v56  ;;  %v157_v25 = vpop.permute.xlu0 %156  ;;  %v179_v63 = vsub.f32 %v159_v40, %v399_v26 }
  0xbb   :  { %v178_v1 = vsub.f32 %v157_v25, %v401_v27  ;;  %230 = vst [vmem:[%s588_s2 + $0x48] sm:$0xf] %v214_v9 }
  0xbc   :  { %229 = vst [vmem:[%s588_s2 + $0x40] sm:$0xff] %v213_v24  ;;  %v198_v3 = vsel %vm186_vm0, %v131_v41, %v179_v63 }
  0xbd   :  { %v197_v10 = vsel %vm186_vm0, %v130_v62, %v178_v1  ;;  %v216_v11 = vsub.f32 %v198_v3, %v447_v54  ;;  %v163_v42 = vpop.permute.xlu1 %162 }
  0xbe   :  { %v215_v26 = vsub.f32 %v197_v10, %v452_v56  ;;  %v161_v27 = vpop.permute.xlu0 %160  ;;  %v181_v17 = vsub.f32 %v163_v42, %v407_v28 }
  0xbf   :  { %v180_v33 = vsub.f32 %v161_v27, %v409_v29  ;;  %232 = vst [vmem:[%s588_s2 + $0x58] sm:$0xf] %v216_v11 }
  0xc0   :  { %231 = vst [vmem:[%s588_s2 + $0x50] sm:$0xff] %v215_v26  ;;  %v200_v0 = vsel %vm186_vm0, %v133_v43, %v181_v17 }
  0xc1   :  { %v199_v12 = vsel %vm186_vm0, %v132_v16, %v180_v33  ;;  %v218_v13 = vsub.f32 %v200_v0, %v447_v54  ;;  %v167_v44 = vpop.permute.xlu1 %166 }
  0xc2   :  { %v217_v28 = vsub.f32 %v199_v12, %v452_v56  ;;  %v165_v29 = vpop.permute.xlu0 %164  ;;  %v183_v18 = vsub.f32 %v167_v44, %v415_v30 }
  0xc3   :  { %v182_v32 = vsub.f32 %v165_v29, %v417_v31  ;;  %234 = vst [vmem:[%s588_s2 + $0x68] sm:$0xf] %v218_v13 }
  0xc4   :  { %233 = vst [vmem:[%s588_s2 + $0x60] sm:$0xff] %v217_v28  ;;  %v202_v19 = vsel %vm186_vm0, %v135_v45, %v183_v18 }
  0xc5   :  { %v201_v14 = vsel %vm186_vm0, %v134_v2, %v182_v32  ;;  %v220_v15 = vsub.f32 %v202_v19, %v447_v54 }
  0xc6   :  { %v219_v30 = vsub.f32 %v201_v14, %v452_v56 }
  0xc7   :  { %236 = vst [vmem:[%s588_s2 + $0x78] sm:$0xf] %v220_v15 }
  0xc8   :  { %235 = vst [vmem:[%s588_s2 + $0x70] sm:$0xff] %v219_v30 }
  0xc9   :  { %241 = vsyncpa [#allocation3], 1 }

</bundles_post_ra>
